<compile_context>
chip_gen: v7x
topology: tpu7x:2x2x1
jax: 0.10.0
libtpu: 0.0.40
codegen_flags: <defaults>
</compile_context>

<pallas_src>
import itertools
import functools
import numpy as np
import jax
import jax.numpy as jnp
from jax.experimental import pallas as pl
from jax.experimental.pallas import tpu as pltpu

BETA = 100.0          # Softplus beta used by Implicit_Map
LATENT_SIZE = 1       # Color_NGP's reshape(-1, 4) forces 3 + latent_size == 4
SDF_DIMS = (64, 64)   # hidden dims of the SDF net (latent_in = () in this config)

N_LEVELS = 16
N_FEATS_PER_LEVEL = 2
LOG2_HASHMAP_SIZE = 19
BASE_RESOLUTION = 16
PER_LEVEL_SCALE = 1.3819

_PRIMES = np.array([1, 2654435761, 805459861, 3674653429], dtype=np.uint32)
_CORNERS = np.array(list(itertools.product((0, 1), repeat=4)), dtype=np.uint32)  # (16, 4)


# --------------------------- chip-aware defaults ----------------------------

def _chip_props():
    """Returns (two_tensorcores, bf16_vpu_eup).  Conservative on failure."""
    try:
        kind = jax.devices()[0].device_kind.lower()
    except Exception:
        kind = ""
    two_tc = "v7" in kind                          # v7x: 2 TCs share the grid
    bf16_vpu = ("v6" in kind) or ("v7" in kind)    # packed-bf16 VPU/EUP
    return two_tc, bf16_vpu


# ------------------------- in-kernel math helpers -------------------------

def _gelu_tanh(x):
    # tanh-form GELU: the tanh runs on the EUP slot.  Python-float constants are
    # weakly typed so the math stays in x.dtype (bf16 fast path on v6e/v7x).
    return 0.5 * x * (1.0 + jnp.tanh(0.7978845608028654 * (x + 0.044715 * x * x * x)))


def _softplus_beta(x, beta=BETA):
    # torch.nn.Softplus(beta=100) incl. its beta*x > threshold(=20) linear
    # branch.  Kept in f32 everywhere: bf16 softplus(beta=100) accuracy is
    # unvalidated (review note) and v5e has no bf16 EUP anyway.
    bx = beta * x
    safe = jnp.minimum(bx, 20.0)
    return jnp.where(bx > 20.0, x, jnp.log1p(jnp.exp(safe)) * (1.0 / beta))


# ------------------------------ Pallas kernel ------------------------------

def _fused_sdf_color_kernel(enc_ref, xs_ref,
                            w1c_ref, w2c_ref, w1s_ref, w2s_ref,
                            wol_ref, wor_ref, bhid_ref, bo_ref,
                            out_ref, *, gelu_dtype):
    f32 = jnp.float32
    op_dt = w2c_ref.dtype            # MXU operand dtype (bf16 fast / f32 reference)

    b = bhid_ref[...]                # (64, 4) f32: [b1_color | b2_color | b1_sdf | b2_sdf]
    b1c, b2c, b1s, b2s = b[:, 0:1], b[:, 1:2], b[:, 2:3], b[:, 3:4]

    # --- Color_NGP backbone, feature-major: activations are (64, tm) ---------
    z = jnp.dot(w1c_ref[...], enc_ref[...], preferred_element_type=f32) + b1c
    h = _gelu_tanh(z.astype(gelu_dtype))                                  # (64, tm)
    z = jnp.dot(w2c_ref[...], h.astype(op_dt), preferred_element_type=f32) + b2c
    h = _gelu_tanh(z.astype(gelu_dtype))                                  # (64, tm)

    # --- SDF net (geometric init): first 4->64 layer kept fully in f32 -------
    y = jnp.dot(w1s_ref[...], xs_ref[...], preferred_element_type=f32) + b1s
    y = _softplus_beta(y)                                                 # (64, tm) f32
    y = jnp.dot(w2s_ref[...], y.astype(op_dt), preferred_element_type=f32) + b2s
    y = _softplus_beta(y)                                                 # (64, tm) f32

    # --- Output head == torch.cat([sdf, color], -1), already transposed ------
    # out^T = Wo_sdf @ y + Wo_color @ h + bo; rows = [sdf, r, g, b, 0, 0, 0, 0].
    # Two skinny (8,64)@(64,tm) dots: no concat / relayout, lane-dense
    # full-sublane store of the (8, tm) block.
    o = (jnp.dot(wol_ref[...], y, preferred_element_type=f32)
         + jnp.dot(wor_ref[...], h.astype(wor_ref.dtype), preferred_element_type=f32)
         + bo_ref[...])
    out_ref[...] = o.astype(out_ref.dtype)


def _choose_tile(M, tm_max, two_tc):
    """Lane-major point tile (multiple of 128).  Large tiles amortize the
    ~0.35us/step pipeline overhead; on 2-TC chips (v7x) keep an even number of
    grid steps so both cores get equal work under dimension_semantics=parallel.
    On 1-TC chips never split just for the sake of it."""
    lane = 128
    Mp = ((M + lane - 1) // lane) * lane
    tm = min(tm_max, Mp)
    if two_tc and Mp > lane:
        steps = max(2, (Mp + tm - 1) // tm)
        steps += steps % 2                                   # even step count
        tm = (((Mp + steps - 1) // steps) + lane - 1) // lane * lane
    return max(tm, lane)


def fused_forward(enc_t, xs_t, params, *, tm, use_bf16=True, gelu_bf16=False):
    """enc_t: (32, Mp) feature-major hash-grid features, xs_t: (8, Mp) f32 with
    rows [x, y, z, latent, 0, 0, 0, 0].  Returns (8, Mp) f32 whose rows 0..3 are
    [sdf, r, g, b] (rows 4..7 are zero padding for full-sublane stores)."""
    f_enc, Mp = enc_t.shape
    assert Mp % tm == 0
    n_steps = Mp // tm

    op_dt = jnp.bfloat16 if use_bf16 else jnp.float32
    gelu_dt = jnp.bfloat16 if (use_bf16 and gelu_bf16) else jnp.float32

    # Feature-major (out, in) weights == PyTorch's native nn.Linear layout.
    w1c = params["cw1"].T.astype(op_dt)                       # (64, 32)
    w2c = params["cw2"].T.astype(op_dt)                       # (64, 64)
    w1s = jnp.pad(params["sw0"].T, ((0, 0), (0, 4)))          # (64, 8) f32, cols 4..7 zero
    w2s = params["sw1"].T.astype(op_dt)                       # (64, 64)

    # Output head split per branch: row 0 = sdf head, rows 1..3 = color head,
    # rows 4..7 zero.  The sdf head stays f32 so the 1e-4 geometric-init
    # perturbation of sw2 is not rounded away (review correctness note).
    wol = jnp.zeros((8, 64), jnp.float32).at[0:1].set(params["sw2"].T)
    wor = jnp.zeros((8, 64), jnp.float32).at[1:4].set(params["cw3"].T).astype(gelu_dt)
    bo = (jnp.zeros((8, 1), jnp.float32)
          .at[0:1].set(params["sb2"].T)
          .at[1:4].set(params["cb3"].T))

    # Hidden biases packed into a single (64, 4) operand (fewer inputs / less
    # per-step DMA + VMEM bookkeeping).
    bhid = jnp.concatenate([params["cb1"].T, params["cb2"].T,
                            params["sb0"].T, params["sb1"].T], axis=1)   # (64, 4) f32

    weights = [w1c, w2c, w1s, w2s, wol, wor, bhid, bo]

    in_specs = [pl.BlockSpec((f_enc, tm), lambda i: (0, i)),
                pl.BlockSpec((xs_t.shape[0], tm), lambda i: (0, i))]
    # weights are tiny (<60 KiB total): keep each fully VMEM-resident.
    in_specs += [pl.BlockSpec(w.shape, lambda i: (0, 0)) for w in weights]

    flops = 2 * Mp * (64 * 32 + 64 * 8 + 2 * 64 * 64 + 2 * 8 * 64)
    transcendentals = Mp * 384        # 2x64 tanh + 2x64 (exp + log)
    bytes_accessed = (enc_t.size * enc_t.dtype.itemsize + xs_t.size * 4 + Mp * 8 * 4
                      + sum(int(w.size) * w.dtype.itemsize for w in weights))

    out = pl.pallas_call(
        functools.partial(_fused_sdf_color_kernel, gelu_dtype=gelu_dt),
        out_shape=jax.ShapeDtypeStruct((8, Mp), jnp.float32),
        grid_spec=pltpu.PrefetchScalarGridSpec(
            num_scalar_prefetch=0,
            grid=(n_steps,),
            in_specs=in_specs,
            out_specs=pl.BlockSpec((8, tm), lambda i: (0, i)),
        ),
        compiler_params=pltpu.CompilerParams(
            dimension_semantics=("parallel",),
            vmem_limit_bytes=32 * 1024 * 1024),
        cost_estimate=pl.CostEstimate(flops=int(flops),
                                      transcendentals=int(transcendentals),
                                      bytes_accessed=int(bytes_accessed)),
    )(enc_t, xs_t, *weights)
    return out


# ------------------------ HashGrid encoding (JAX glue) ----------------------

def hash_grid_encode_t(x, tables, out_dtype=jnp.float32):
    """x: (Mp, 4) in [0, 1]; tables: (L, T, F).  Returns feature-major
    (L*F, Mp) so the Pallas kernel consumes it without any transpose/pad."""
    # TODO(synk): port the gather + interpolation to a Pallas kernel (manual DMA
    # of table pages) so the (Mp,16,F) temporaries never round-trip HBM.
    L, T, F = tables.shape
    primes = jnp.asarray(_PRIMES)
    corners = jnp.asarray(_CORNERS)
    feats = []
    for lvl in range(L):
        scale = BASE_RESOLUTION * (PER_LEVEL_SCALE ** lvl)
        pos = x * np.float32(scale)
        pos_grid = jnp.floor(pos)
        frac = pos - pos_grid
        pos_grid = pos_grid.astype(jnp.uint32)

        coords = pos_grid[:, None, :] + corners[None, :, :]                 # (Mp, 16, 4)
        w = jnp.prod(jnp.where(corners[None, :, :] == 1,
                               frac[:, None, :], 1.0 - frac[:, None, :]),
                     axis=-1)                                               # (Mp, 16)
        hashed = coords * primes[None, None, :]
        idx = (hashed[..., 0] ^ hashed[..., 1] ^ hashed[..., 2] ^ hashed[..., 3])
        idx = (idx & jnp.uint32(T - 1)).astype(jnp.int32)
        corner_feats = jnp.take(tables[lvl], idx, axis=0)                   # (Mp, 16, F)
        feats.append(jnp.einsum("mc,mcf->fm", w, corner_feats).astype(out_dtype))
    return jnp.concatenate(feats, axis=0)                                   # (L*F, Mp)


# ------------------------------ parameter init ------------------------------

def init_params(key):
    keys = jax.random.split(key, 12)
    T = 2 ** LOG2_HASHMAP_SIZE
    # tcnn default hash-table init: U(-1e-4, 1e-4)
    tables = jax.random.uniform(keys[0], (N_LEVELS, T, N_FEATS_PER_LEVEL),
                                jnp.float32, -1e-4, 1e-4)

    def torch_linear(k, fan_in, fan_out):       # nn.Linear default init
        k1, k2 = jax.random.split(k)
        bound = 1.0 / np.sqrt(fan_in)
        w = jax.random.uniform(k1, (fan_in, fan_out), jnp.float32, -bound, bound)
        b = jax.random.uniform(k2, (1, fan_out), jnp.float32, -bound, bound)
        return w, b

    cw1, cb1 = torch_linear(keys[1], N_LEVELS * N_FEATS_PER_LEVEL, 64)
    cw2, cb2 = torch_linear(keys[2], 64, 64)
    cw3, cb3 = torch_linear(keys[3], 64, 3)

    # SDF net geometric init (Implicit_Map.__init__ with geometric_init=True)
    d_in = LATENT_SIZE + 3
    dims_full = [d_in] + list(SDF_DIMS) + [1]
    sdf_w, sdf_b = [], []
    for l in range(len(dims_full) - 1):
        fan_in, fan_out = dims_full[l], dims_full[l + 1]
        k = keys[4 + l]
        if l == len(dims_full) - 2:   # last layer
            w = (np.sqrt(np.pi) / np.sqrt(fan_in)
                 + 1e-4 * jax.random.normal(k, (fan_in, fan_out), jnp.float32))
            b = jnp.full((1, fan_out), -1.0, jnp.float32)
        else:
            w = (np.sqrt(2.0) / np.sqrt(fan_out)) * jax.random.normal(
                k, (fan_in, fan_out), jnp.float32)
            b = jnp.zeros((1, fan_out), jnp.float32)
        sdf_w.append(w)
        sdf_b.append(b)

    return dict(tables=tables,
                cw1=cw1, cb1=cb1, cw2=cw2, cb2=cb2, cw3=cw3, cb3=cb3,
                sw0=sdf_w[0], sb0=sdf_b[0],
                sw1=sdf_w[1], sb1=sdf_b[1],
                sw2=sdf_w[2], sb2=sdf_b[2])


# --------------------------- full module forward ----------------------------

def implicit_color_map_forward(inputs, latent, params, *,
                               use_bf16=True, tm_max=None, gelu_bf16=None):
    """inputs: (B, N, 3), latent: (B, latent_size) with latent_size == 1.
    Returns (B, N, 4) float32 = torch.cat([sdf, color], -1)."""
    assert latent.ndim == 2 and latent.shape[0] == inputs.shape[0]
    assert latent.shape[1] == LATENT_SIZE
    B, N, _ = inputs.shape
    M = B * N

    two_tc, bf16_vpu = _chip_props()
    if gelu_bf16 is None:
        gelu_bf16 = bf16_vpu            # bf16 activation math only on v6e/v7x
    if tm_max is None:
        tm_max = 2048 if two_tc else 4096   # sweep per chip; v7x has only 64 MiB VMEM

    tm = _choose_tile(M, tm_max, two_tc)
    n_steps = (M + tm - 1) // tm
    Mp = n_steps * tm

    latent_rep = jnp.broadcast_to(latent[:, None, :], (B, N, latent.shape[-1]))
    x = jnp.concatenate([inputs, latent_rep], axis=-1).reshape(M, 4)
    # Pad the point axis once, up front, on the narrow (M, 4) coordinates so the
    # wide (32, Mp) encoder output needs no post-hoc pad/cast copy.
    xpad = jnp.pad(x, ((0, Mp - M), (0, 0)))                                # (Mp, 4) f32

    # SDF branch input: feature-major, 8 rows ([xyz, latent] + 4 zero rows), f32.
    xs_t = jnp.pad(xpad, ((0, 0), (0, 4))).T                                # (8, Mp)

    # Color branch: (x + 1) / 2 -> hash-grid encode, emitted feature-major and
    # in bf16 on the fast path (halves the kernel's dominant HBM input stream).
    enc_dt = jnp.bfloat16 if use_bf16 else jnp.float32
    enc_t = hash_grid_encode_t((xpad + 1.0) * 0.5, params["tables"],
                               out_dtype=enc_dt)                            # (32, Mp)

    out_t = fused_forward(enc_t, xs_t, params, tm=tm,
                          use_bf16=use_bf16, gelu_bf16=gelu_bf16)           # (8, Mp)
    return out_t[:4, :M].T.reshape(B, N, 4)


if __name__ == "__main__":
    key = jax.random.PRNGKey(0)
    k_par, k_in, k_lat = jax.random.split(key, 3)

    params = init_params(k_par)

    B, N = 2, 16
    inputs = jax.random.uniform(k_in, (B, N, 3), jnp.float32, -1.0, 1.0)
    latent = jax.random.uniform(k_lat, (B, LATENT_SIZE), jnp.float32, -1.0, 1.0)

    out = implicit_color_map_forward(inputs, latent, params)
    out = jax.block_until_ready(out)

    assert out.shape == (B, N, 4)
    assert bool(jnp.all(jnp.isfinite(out)))
    print("KERNEL_OK")
</pallas_src>

<mosaic_0001>
module attributes {stable_mosaic.version = 11 : i64} {
  func.func @_fused_sdf_color_kernel(%arg0: i32, %arg1: memref<32x128xbf16, #tpu.memory_space<vmem>>, %arg2: memref<8x128xf32, #tpu.memory_space<vmem>>, %arg3: memref<64x32xbf16, #tpu.memory_space<vmem>>, %arg4: memref<64x64xbf16, #tpu.memory_space<vmem>>, %arg5: memref<64x8xf32, #tpu.memory_space<vmem>>, %arg6: memref<64x64xbf16, #tpu.memory_space<vmem>>, %arg7: memref<8x64xf32, #tpu.memory_space<vmem>>, %arg8: memref<8x64xf32, #tpu.memory_space<vmem>>, %arg9: memref<64x4xf32, #tpu.memory_space<vmem>>, %arg10: memref<8x1xf32, #tpu.memory_space<vmem>>, %arg11: memref<8x128xf32, #tpu.memory_space<vmem>>) attributes {dimension_semantics = [#tpu.dimension_semantics<parallel>], iteration_bounds = array<i64: 1>, scalar_prefetch = 0 : i64, scratch_operands = 0 : i64, tpu.core_type = #tpu.core_type<tc>, window_params = [{transform_indices = @transform_0, window_bounds = array<i64: 32, 128>}, {transform_indices = @transform_1, window_bounds = array<i64: 8, 128>}, {pipeline_mode = #tpu.pipeline_mode<synchronous>, transform_indices = @transform_2, window_bounds = array<i64: 64, 32>}, {pipeline_mode = #tpu.pipeline_mode<synchronous>, transform_indices = @transform_3, window_bounds = array<i64: 64, 64>}, {pipeline_mode = #tpu.pipeline_mode<synchronous>, transform_indices = @transform_4, window_bounds = array<i64: 64, 8>}, {pipeline_mode = #tpu.pipeline_mode<synchronous>, transform_indices = @transform_5, window_bounds = array<i64: 64, 64>}, {pipeline_mode = #tpu.pipeline_mode<synchronous>, transform_indices = @transform_6, window_bounds = array<i64: 8, 64>}, {pipeline_mode = #tpu.pipeline_mode<synchronous>, transform_indices = @transform_7, window_bounds = array<i64: 8, 64>}, {pipeline_mode = #tpu.pipeline_mode<synchronous>, transform_indices = @transform_8, window_bounds = array<i64: 64, 4>}, {pipeline_mode = #tpu.pipeline_mode<synchronous>, transform_indices = @transform_9, window_bounds = array<i64: 8, 1>}, {transform_indices = @transform_10, window_bounds = array<i64: 8, 128>}]} {
    %c0 = arith.constant 0 : index
    %c0_0 = arith.constant 0 : index
    %0 = vector.load %arg9[%c0, %c0_0] : memref<64x4xf32, #tpu.memory_space<vmem>>, vector<64x4xf32>
    %1 = vector.extract_strided_slice %0 {offsets = [0, 0], sizes = [64, 1], strides = [1, 1]} : vector<64x4xf32> to vector<64x1xf32>
    %2 = vector.extract_strided_slice %0 {offsets = [0, 1], sizes = [64, 1], strides = [1, 1]} : vector<64x4xf32> to vector<64x1xf32>
    %3 = vector.extract_strided_slice %0 {offsets = [0, 2], sizes = [64, 1], strides = [1, 1]} : vector<64x4xf32> to vector<64x1xf32>
    %4 = vector.extract_strided_slice %0 {offsets = [0, 3], sizes = [64, 1], strides = [1, 1]} : vector<64x4xf32> to vector<64x1xf32>
    %c0_1 = arith.constant 0 : index
    %c0_2 = arith.constant 0 : index
    %5 = vector.load %arg3[%c0_1, %c0_2] : memref<64x32xbf16, #tpu.memory_space<vmem>>, vector<64x32xbf16>
    %c0_3 = arith.constant 0 : index
    %c0_4 = arith.constant 0 : index
    %6 = vector.load %arg1[%c0_3, %c0_4] : memref<32x128xbf16, #tpu.memory_space<vmem>>, vector<32x128xbf16>
    %cst = arith.constant dense<0.000000e+00> : vector<64x128xf32>
    %7 = tpu.matmul %5, %6, %cst {dimension_numbers = #tpu.dot_dimension_numbers<[1], [0], [0], [1], [0, 0, 1, 1], [], []>} : vector<64x32xbf16>, vector<32x128xbf16>, vector<64x128xf32> -> vector<64x128xf32>
    %8 = vector.broadcast %1 : vector<64x1xf32> to vector<64x128xf32>
    %9 = arith.addf %7, %8 : vector<64x128xf32>
    %cst_5 = arith.constant 5.000000e-01 : f32
    %10 = vector.broadcast %cst_5 : f32 to vector<64x128xf32>
    %11 = arith.mulf %10, %9 : vector<64x128xf32>
    %cst_6 = arith.constant 4.471500e-02 : f32
    %12 = vector.broadcast %cst_6 : f32 to vector<64x128xf32>
    %13 = arith.mulf %12, %9 : vector<64x128xf32>
    %14 = arith.mulf %13, %9 : vector<64x128xf32>
    %15 = arith.mulf %14, %9 : vector<64x128xf32>
    %16 = arith.addf %9, %15 : vector<64x128xf32>
    %cst_7 = arith.constant 0.797884583 : f32
    %17 = vector.broadcast %cst_7 : f32 to vector<64x128xf32>
    %18 = arith.mulf %17, %16 : vector<64x128xf32>
    %19 = math.tanh %18 : vector<64x128xf32>
    %cst_8 = arith.constant 1.000000e+00 : f32
    %20 = vector.broadcast %cst_8 : f32 to vector<64x128xf32>
    %21 = arith.addf %20, %19 : vector<64x128xf32>
    %22 = arith.mulf %11, %21 : vector<64x128xf32>
    %c0_9 = arith.constant 0 : index
    %c0_10 = arith.constant 0 : index
    %23 = vector.load %arg4[%c0_9, %c0_10] : memref<64x64xbf16, #tpu.memory_space<vmem>>, vector<64x64xbf16>
    %24 = arith.truncf %22 : vector<64x128xf32> to vector<64x128xbf16>
    %cst_11 = arith.constant dense<0.000000e+00> : vector<64x128xf32>
    %25 = tpu.matmul %23, %24, %cst_11 {dimension_numbers = #tpu.dot_dimension_numbers<[1], [0], [0], [1], [0, 0, 1, 1], [], []>} : vector<64x64xbf16>, vector<64x128xbf16>, vector<64x128xf32> -> vector<64x128xf32>
    %26 = vector.broadcast %2 : vector<64x1xf32> to vector<64x128xf32>
    %27 = arith.addf %25, %26 : vector<64x128xf32>
    %cst_12 = arith.constant 5.000000e-01 : f32
    %28 = vector.broadcast %cst_12 : f32 to vector<64x128xf32>
    %29 = arith.mulf %28, %27 : vector<64x128xf32>
    %cst_13 = arith.constant 4.471500e-02 : f32
    %30 = vector.broadcast %cst_13 : f32 to vector<64x128xf32>
    %31 = arith.mulf %30, %27 : vector<64x128xf32>
    %32 = arith.mulf %31, %27 : vector<64x128xf32>
    %33 = arith.mulf %32, %27 : vector<64x128xf32>
    %34 = arith.addf %27, %33 : vector<64x128xf32>
    %cst_14 = arith.constant 0.797884583 : f32
    %35 = vector.broadcast %cst_14 : f32 to vector<64x128xf32>
    %36 = arith.mulf %35, %34 : vector<64x128xf32>
    %37 = math.tanh %36 : vector<64x128xf32>
    %cst_15 = arith.constant 1.000000e+00 : f32
    %38 = vector.broadcast %cst_15 : f32 to vector<64x128xf32>
    %39 = arith.addf %38, %37 : vector<64x128xf32>
    %40 = arith.mulf %29, %39 : vector<64x128xf32>
    %c0_16 = arith.constant 0 : index
    %c0_17 = arith.constant 0 : index
    %41 = vector.load %arg5[%c0_16, %c0_17] : memref<64x8xf32, #tpu.memory_space<vmem>>, vector<64x8xf32>
    %c0_18 = arith.constant 0 : index
    %c0_19 = arith.constant 0 : index
    %42 = vector.load %arg2[%c0_18, %c0_19] : memref<8x128xf32, #tpu.memory_space<vmem>>, vector<8x128xf32>
    %cst_20 = arith.constant dense<0.000000e+00> : vector<64x128xf32>
    %43 = tpu.matmul %41, %42, %cst_20 {dimension_numbers = #tpu.dot_dimension_numbers<[1], [0], [0], [1], [0, 0, 1, 1], [], []>} : vector<64x8xf32>, vector<8x128xf32>, vector<64x128xf32> -> vector<64x128xf32>
    %44 = vector.broadcast %3 : vector<64x1xf32> to vector<64x128xf32>
    %45 = arith.addf %43, %44 : vector<64x128xf32>
    %cst_21 = arith.constant 1.000000e+02 : f32
    %46 = vector.broadcast %cst_21 : f32 to vector<64x128xf32>
    %47 = arith.mulf %46, %45 : vector<64x128xf32>
    %cst_22 = arith.constant 2.000000e+01 : f32
    %48 = vector.broadcast %cst_22 : f32 to vector<64x128xf32>
    %49 = arith.minimumf %47, %48 : vector<64x128xf32>
    %cst_23 = arith.constant 2.000000e+01 : f32
    %50 = vector.broadcast %cst_23 : f32 to vector<64x128xf32>
    %51 = arith.cmpf ogt, %47, %50 : vector<64x128xf32>
    %52 = math.exp %49 : vector<64x128xf32>
    %53 = math.log1p %52 : vector<64x128xf32>
    %cst_24 = arith.constant 0.00999999977 : f32
    %54 = vector.broadcast %cst_24 : f32 to vector<64x128xf32>
    %55 = arith.mulf %53, %54 : vector<64x128xf32>
    %56 = arith.select %51, %45, %55 : vector<64x128xi1>, vector<64x128xf32>
    %c0_25 = arith.constant 0 : index
    %c0_26 = arith.constant 0 : index
    %57 = vector.load %arg6[%c0_25, %c0_26] : memref<64x64xbf16, #tpu.memory_space<vmem>>, vector<64x64xbf16>
    %58 = arith.truncf %56 : vector<64x128xf32> to vector<64x128xbf16>
    %cst_27 = arith.constant dense<0.000000e+00> : vector<64x128xf32>
    %59 = tpu.matmul %57, %58, %cst_27 {dimension_numbers = #tpu.dot_dimension_numbers<[1], [0], [0], [1], [0, 0, 1, 1], [], []>} : vector<64x64xbf16>, vector<64x128xbf16>, vector<64x128xf32> -> vector<64x128xf32>
    %60 = vector.broadcast %4 : vector<64x1xf32> to vector<64x128xf32>
    %61 = arith.addf %59, %60 : vector<64x128xf32>
    %cst_28 = arith.constant 1.000000e+02 : f32
    %62 = vector.broadcast %cst_28 : f32 to vector<64x128xf32>
    %63 = arith.mulf %62, %61 : vector<64x128xf32>
    %cst_29 = arith.constant 2.000000e+01 : f32
    %64 = vector.broadcast %cst_29 : f32 to vector<64x128xf32>
    %65 = arith.minimumf %63, %64 : vector<64x128xf32>
    %cst_30 = arith.constant 2.000000e+01 : f32
    %66 = vector.broadcast %cst_30 : f32 to vector<64x128xf32>
    %67 = arith.cmpf ogt, %63, %66 : vector<64x128xf32>
    %68 = math.exp %65 : vector<64x128xf32>
    %69 = math.log1p %68 : vector<64x128xf32>
    %cst_31 = arith.constant 0.00999999977 : f32
    %70 = vector.broadcast %cst_31 : f32 to vector<64x128xf32>
    %71 = arith.mulf %69, %70 : vector<64x128xf32>
    %72 = arith.select %67, %61, %71 : vector<64x128xi1>, vector<64x128xf32>
    %c0_32 = arith.constant 0 : index
    %c0_33 = arith.constant 0 : index
    %73 = vector.load %arg7[%c0_32, %c0_33] : memref<8x64xf32, #tpu.memory_space<vmem>>, vector<8x64xf32>
    %cst_34 = arith.constant dense<0.000000e+00> : vector<8x128xf32>
    %74 = tpu.matmul %73, %72, %cst_34 {dimension_numbers = #tpu.dot_dimension_numbers<[1], [0], [0], [1], [0, 0, 1, 1], [], []>} : vector<8x64xf32>, vector<64x128xf32>, vector<8x128xf32> -> vector<8x128xf32>
    %c0_35 = arith.constant 0 : index
    %c0_36 = arith.constant 0 : index
    %75 = vector.load %arg8[%c0_35, %c0_36] : memref<8x64xf32, #tpu.memory_space<vmem>>, vector<8x64xf32>
    %cst_37 = arith.constant dense<0.000000e+00> : vector<8x128xf32>
    %76 = tpu.matmul %75, %40, %cst_37 {dimension_numbers = #tpu.dot_dimension_numbers<[1], [0], [0], [1], [0, 0, 1, 1], [], []>} : vector<8x64xf32>, vector<64x128xf32>, vector<8x128xf32> -> vector<8x128xf32>
    %77 = arith.addf %74, %76 : vector<8x128xf32>
    %c0_38 = arith.constant 0 : index
    %c0_39 = arith.constant 0 : index
    %78 = vector.load %arg10[%c0_38, %c0_39] : memref<8x1xf32, #tpu.memory_space<vmem>>, vector<8x1xf32>
    %79 = vector.broadcast %78 : vector<8x1xf32> to vector<8x128xf32>
    %80 = arith.addf %77, %79 : vector<8x128xf32>
    %c0_40 = arith.constant 0 : index
    %c0_41 = arith.constant 0 : index
    %81 = vector.load %arg11[%c0_40, %c0_41] : memref<8x128xf32, #tpu.memory_space<vmem>>, vector<8x128xf32>
    tpu.vector_store %arg11[%c0_40, %c0_41], %80 {strides = array<i32>} : memref<8x128xf32, #tpu.memory_space<vmem>>, vector<8x128xf32>,
    return
  }
  func.func @transform_0(%arg0: i32) -> (i32, i32) {
    %c0_i32 = arith.constant 0 : i32
    %c0_i32_0 = arith.constant 0 : i32
    return %c0_i32, %arg0 : i32, i32
  }
  func.func @transform_1(%arg0: i32) -> (i32, i32) {
    %c0_i32 = arith.constant 0 : i32
    %c0_i32_0 = arith.constant 0 : i32
    return %c0_i32, %arg0 : i32, i32
  }
  func.func @transform_2(%arg0: i32) -> (i32, i32) {
    %c0_i32 = arith.constant 0 : i32
    %c0_i32_0 = arith.constant 0 : i32
    %c0_i32_1 = arith.constant 0 : i32
    return %c0_i32, %c0_i32_0 : i32, i32
  }
  func.func @transform_3(%arg0: i32) -> (i32, i32) {
    %c0_i32 = arith.constant 0 : i32
    %c0_i32_0 = arith.constant 0 : i32
    %c0_i32_1 = arith.constant 0 : i32
    return %c0_i32, %c0_i32_0 : i32, i32
  }
  func.func @transform_4(%arg0: i32) -> (i32, i32) {
    %c0_i32 = arith.constant 0 : i32
    %c0_i32_0 = arith.constant 0 : i32
    %c0_i32_1 = arith.constant 0 : i32
    return %c0_i32, %c0_i32_0 : i32, i32
  }
  func.func @transform_5(%arg0: i32) -> (i32, i32) {
    %c0_i32 = arith.constant 0 : i32
    %c0_i32_0 = arith.constant 0 : i32
    %c0_i32_1 = arith.constant 0 : i32
    return %c0_i32, %c0_i32_0 : i32, i32
  }
  func.func @transform_6(%arg0: i32) -> (i32, i32) {
    %c0_i32 = arith.constant 0 : i32
    %c0_i32_0 = arith.constant 0 : i32
    %c0_i32_1 = arith.constant 0 : i32
    return %c0_i32, %c0_i32_0 : i32, i32
  }
  func.func @transform_7(%arg0: i32) -> (i32, i32) {
    %c0_i32 = arith.constant 0 : i32
    %c0_i32_0 = arith.constant 0 : i32
    %c0_i32_1 = arith.constant 0 : i32
    return %c0_i32, %c0_i32_0 : i32, i32
  }
  func.func @transform_8(%arg0: i32) -> (i32, i32) {
    %c0_i32 = arith.constant 0 : i32
    %c0_i32_0 = arith.constant 0 : i32
    %c0_i32_1 = arith.constant 0 : i32
    return %c0_i32, %c0_i32_0 : i32, i32
  }
  func.func @transform_9(%arg0: i32) -> (i32, i32) {
    %c0_i32 = arith.constant 0 : i32
    %c0_i32_0 = arith.constant 0 : i32
    %c0_i32_1 = arith.constant 0 : i32
    return %c0_i32, %c0_i32_0 : i32, i32
  }
  func.func @transform_10(%arg0: i32) -> (i32, i32) {
    %c0_i32 = arith.constant 0 : i32
    %c0_i32_0 = arith.constant 0 : i32
    return %c0_i32, %arg0 : i32, i32
  }
}

</mosaic_0001>

<bundles_post_ra>
// kernel: tpu_custom_call.1
= control target key start
LH: loop header
LB: loop body
LE: loop exit
PB: predicated region body
PF: predicated region fallthrough
CT: control target
= control target key end

     0   :  { %vm129_vm0 = vcmask 261120   ;;  %v1597_v3 = vmov 0   ;;  %v1598_v5 = vmov 2   ;;  %vm534_vm1 = vcmask 64512   ;;  %s2243_s0 = inlined_call_operand.vmem [shape: bf16[32,128], index: 0, kind: input, shape index: {}]   ;;  %s2244_s1 = inlined_call_operand.vmem [shape: f32[8,128], index: 1, kind: input, shape index: {}]   ;;  %s2245_s2 = inlined_call_operand.vmem [shape: bf16[64,32], index: 2, kind: input, shape index: {}]   ;;  %s2246_s3 = inlined_call_operand.vmem [shape: bf16[64,64], index: 3, kind: input, shape index: {}]   ;;  %s2247_s4 = inlined_call_operand.vmem [shape: f32[64,8], index: 4, kind: input, shape index: {}]   ;;  %s2248_s5 = inlined_call_operand.vmem [shape: bf16[64,64], index: 5, kind: input, shape index: {}]   ;;  %s2249_s6 = inlined_call_operand.vmem [shape: f32[8,64], index: 6, kind: input, shape index: {}]   ;;  %s2250_s7 = inlined_call_operand.vmem [shape: f32[8,64], index: 7, kind: input, shape index: {}]   ;;  %s2251_s8 = inlined_call_operand.vmem [shape: f32[64,4], index: 8, kind: input, shape index: {}]   ;;  %s2252_s9 = inlined_call_operand.vmem [shape: f32[8,1], index: 9, kind: input, shape index: {}]   ;;  %s2253_s10 = inlined_call_operand.hbm [shape: f32[8,128], index: 10, kind: output, shape index: {}]  }
   0x1   :  { %v1463_v0 = vld [vmem:[%s2243_s0] sm:$0xff]   ;;  %v1464_v1 = vld [vmem:[%s2243_s0 + $0x8] sm:$0xff]   ;;  %1444 = vset.pattern.permute.xlu1 %v1597_v3  ;;  %1445 = vset.pattern.permute.xlu0 %v1598_v5  ;;  %v1467_v7 = vld [vmem:[%s2245_s2 + $0x10] sm:$0xff]  }
   0x2   :  { %1316 = vmatprep.subr.bf16.mxu0 %v1463_v0  ;;  %v1465_v2 = vld [vmem:[%s2245_s2] sm:$0xff]   ;;  %v1466_v6 = vld [vmem:[%s2245_s2 + $0x8] sm:$0xff]   ;;  %v1683_v8 = vld [vmem:[%s2251_s8 + $0x10] sm:$0xff] }
   0x3   :  { %1317 = vmatpush3.bf16.msra.mxu0 %v1463_v0  ;;  %1320 = vmatprep.mubr.msk.bf16.mxu0 %vm129_vm0, %v1465_v2  ;;  %v501_v4 = vld [vmem:[%s2244_s1] sm:$0xff]  ;;  %v1694_v10 = vld [vmem:[%s2251_s8 + $0x18] sm:$0xff]  ;;  %v38_v13 = vld [vmem:[%s2251_s8 + $0x8] sm:$0xff] }
   0x4   :  { %1318 = vmatprep.subr.bf16.mxu0 %v1464_v1  ;;  %69 = vperm.xlu1 %1444, %v1683_v8   ;;  %v37_v9 = vld [vmem:[%s2251_s8] sm:$0xff]  ;;  %v1468_v11 = vld [vmem:[%s2245_s2 + $0x18] sm:$0xff]  }
   0x5   :  { %503 = vperm.xlu0 %1445, %v37_v9   ;;  %v493_v12 = vld [vmem:[%s2247_s4] sm:$0xff] }
   0x7   :  { %1319 = vmatpush3.bf16.msra.mxu0 %v1464_v1 }
   0x8   :  { %1344 = vmatprep.subr.mxu0 %v501_v4  ;;  %74 = vperm.xlu1 %1444, %v1694_v10  }
   0x9   :  { %1446 = vset.pattern.permute.xlu0 %v1597_v3 }
   0xa   :  { %1321 = vmatmul.mubr.msk.bf16.vlgmr.msra.gmra.mrb[0].mxu0 %vm129_vm0, %v1466_v6  ;;  %59 = vperm.xlu0 %1446, %v37_v9  }
   0xb   :  { %1345 = vmatpush3.msra.mxu0 %v501_v4  ;;  %1324 = vmatprep.mubr.msk.bf16.mxu0 %vm129_vm0, %v1467_v7 }
   0xc   :  { %15 = vsyncpa [#allocation3], 0  ;;  %1447 = vset.pattern.permute.xlu1 %v1598_v5  ;;  %v41_v14 = vld [vmem:[%s2251_s8 + $0x20] sm:$0xff]  ;;  %v1715_v15 = vld [vmem:[%s2251_s8 + $0x28] sm:$0xff]  ;;  %vm343_vm2 = vcmask 523264   ;;  %v1599_v26 = vmov 3  }
   0xd   :  { %507 = vperm.xlu1 %1447, %v38_v13   ;;  %v494_v16 = vld [vmem:[%s2247_s4 + $0x8] sm:$0xff]  ;;  %v495_v17 = vld [vmem:[%s2247_s4 + $0x10] sm:$0xff]  ;;  %v496_v19 = vld [vmem:[%s2247_s4 + $0x18] sm:$0xff]  ;;  %v1600_v27 = vmov 1   ;;  %s1604_s27 = smov [#allocation2]  }
   0xe   :  { %64 = vperm.xlu0 %1446, %v38_v13   ;;  %v43_v18 = vld [vmem:[%s2251_s8 + $0x30] sm:$0xff]  ;;  %v497_v20 = vld [vmem:[%s2247_s4 + $0x20] sm:$0xff]  ;;  %v498_v21 = vld [vmem:[%s2247_s4 + $0x28] sm:$0xff]  ;;  %s1223_s28 = sshll.u32 %s1604_s27, 4  ;;  %s1224_s28 = int_to_ptr.vmem [resolvable:$true] %s1223_s28 }
   0xf   :  { %v499_v22 = vld [vmem:[%s2247_s4 + $0x30] sm:$0xff]  ;;  %v500_v23 = vld [vmem:[%s2247_s4 + $0x38] sm:$0xff]  ;;  %v1469_v25 = vld [vmem:[%s2246_s3] sm:$0xff]   ;;  %s1573_s29 = scalar_lea.vmem %s1224_s28, 128  ;;  %p1578_p1 = scmp.lt.s32.totalorder %s1224_s28, %s1224_s28 }
  0x10   :  { %v44_v24 = vld [vmem:[%s2251_s8 + $0x38] sm:$0xff]  ;;  %1336 = vmatprep.mubr.msk.bf16.mxu1 %vm343_vm2, %v1469_v25  ;;  %p1574_p0 = scmp.ne.s32.totalorder %s1224_s28, %s1573_s29  ;;  %p1579_p2 = scmp.lt.s32.totalorder %s1573_s29, %s1573_s29 }
  0x11   :  { %1448 = vset.pattern.permute.xlu1 %v1597_v3 }
  0x12   :  { %1325 = vmatmul.mubr.msk.bf16.gmra.mrb[4].mxu0 %vm129_vm0, %v1468_v11  ;;  %79 = vperm.xlu1 %1448, %v41_v14   ;;  %p1580_p3 = por %p1579_p2, %p1578_p1 }
  0x13   :  { %1346 = vmatprep.mubr.msk.f32.mxu0 %vm534_vm1, %v493_v12  ;;  %84 = vperm.xlu0 %1446, %v1715_v15  }
  0x14   :  { %p1581_p4 = pnand %p1580_p3, %p1574_p0 }
  0x16   :  { %1449 = vset.pattern.permute.xlu1 %v1598_v5 }
  0x17   :  { %511 = vperm.xlu1 %1449, %v1683_v8   ;;  %89 = vperm.xlu0 %1446, %v43_v18  }
  0x1a   :  { %1347 = vmatmul.mubr.msk.f32.vlgmr.msra.gmra.mrb[8].mxu0 %vm534_vm1, %v494_v16 }
  0x1b   :  { %1349 = vmatprep.mubr.msk.f32.mxu0 %vm534_vm1, %v495_v17  ;;  %515 = vperm.xlu1 %1449, %v1694_v10  }
  0x1c   :  { %1451 = vset.pattern.permute.xlu0 %v1598_v5 }
  0x1d   :  { %519 = vperm.xlu0 %1451, %v41_v14  }
  0x1e   :  { %1350 = vmatmul.mubr.msk.f32.gmra.mrb[10].mxu0 %vm534_vm1, %v496_v19 }
  0x1f   :  { %1352 = vmatprep.mubr.msk.f32.mxu0 %vm534_vm1, %v497_v20  ;;  %1450 = vset.pattern.permute.xlu1 %v1597_v3 }
  0x20   :  { %94 = vperm.xlu1 %1450, %v44_v24  }
  0x21   :  { %531 = vperm.xlu0 %1451, %v44_v24  }
  0x22   :  { %1353 = vmatmul.mubr.msk.f32.gmra.mrb[12].mxu0 %vm534_vm1, %v498_v21 }
  0x23   :  { %1355 = vmatprep.mubr.msk.f32.mxu0 %vm534_vm1, %v499_v22 }
  0x24   :  { %1452 = vset.pattern.permute.xlu1 %v1598_v5 }
  0x25   :  { %523 = vperm.xlu1 %1452, %v1715_v15   ;;  %1454 = vset.pattern.permute.xlu0 %v1599_v26 }
  0x26   :  { %1356 = vmatmul.mubr.msk.f32.gmra.mrb[14].mxu0 %vm534_vm1, %v500_v23  ;;  %809 = vperm.xlu0 %1454, %v38_v13  }
  0x29   :  { %527 = vperm.xlu1 %1452, %v43_v18  }
  0x2a   :  { %1455 = vset.pattern.permute.xlu0 %v1600_v27 }
  0x2b   :  { %292 = vperm.xlu0 %1455, %v37_v9  }
  0x2d   :  { %1453 = vset.pattern.permute.xlu1 %v1599_v26 }
  0x2e   :  { %805 = vperm.xlu1 %1453, %v37_v9  }
  0x2f   :  { %1456 = vset.pattern.permute.xlu0 %v1599_v26 }
  0x30   :  { %821 = vperm.xlu0 %1456, %v41_v14  }
  0x32   :  { %813 = vperm.xlu1 %1453, %v1683_v8  }
  0x34   :  { %833 = vperm.xlu0 %1456, %v44_v24  }
  0x36   :  { %817 = vperm.xlu1 %1453, %v1694_v10  }
  0x38   :  { %1460 = vset.pattern.permute.xlu0 %v1600_v27 }
  0x39   :  { %308 = vperm.xlu0 %1460, %v41_v14  }
  0x3a   :  { %825 = vperm.xlu1 %1453, %v1715_v15  }
  0x3d   :  { %320 = vperm.xlu0 %1460, %v44_v24  }
  0x3e   :  { %1457 = vset.pattern.permute.xlu1 %v1600_v27 }
  0x3f   :  { %296 = vperm.xlu1 %1457, %v38_v13  }
  0x41   :  { %1462 = vset.pattern.permute.xlu0 %v1597_v3 }
  0x43   :  { %1458 = vset.pattern.permute.xlu1 %v1599_v26 }
  0x44   :  { %829 = vperm.xlu1 %1458, %v43_v18  }
  0x48   :  { %1459 = vset.pattern.permute.xlu1 %v1600_v27 }
  0x49   :  { %300 = vperm.xlu1 %1459, %v1683_v8  }
  0x4d   :  { %304 = vperm.xlu1 %1459, %v1694_v10  }
  0x51   :  { %312 = vperm.xlu1 %1459, %v1715_v15  }
  0x55   :  { %316 = vperm.xlu1 %1459, %v43_v18  }
  0x59   :  { %1461 = vset.pattern.permute.xlu1 %v1597_v3 }
  0x83   :  { %v70_v28 = vpop.permute.xlu1 %69 }
  0x84   :  { %v1764_v30 = vpop.permute.xlu0 %503 }
  0x87   :  { %v75_v29 = vpop.permute.xlu1 %74 }
  0x89   :  { %v60_v32 = vpop.permute.xlu0 %59 }
  0x8c   :  { %v1766_v31 = vpop.permute.xlu1 %507 }
  0x8d   :  { %v65_v34 = vpop.permute.xlu0 %64 }
  0x91   :  { %v80_v33 = vpop.permute.xlu1 %79 }
  0x92   :  { %v85_v37 = vpop.permute.xlu0 %84 }
  0x96   :  { %v1772_v35 = vpop.permute.xlu1 %511  ;;  %v90_v52 = vpop.permute.xlu0 %89 }
  0x9a   :  { %v516_v42 = vpop.permute.xlu1 %515 }
  0x9f   :  { %v95_v57 = vpop.permute.xlu1 %94 }
  0xdd   :  { %v1322_v36 = vpop.f32.mrb[0].mxu0 }
  0xde   :  { %v1774_v38 = vadd.f32 %v1322_v36, %v70_v28  ;;  %v176_v39 = vpop.f32.mrb[1].mxu0 }
  0xdf   :  { %v1777_v40 = vadd.f32 %v176_v39, %v60_v32  ;;  %v1323_v41 = vpop.f32.mrb[2].mxu0 }
  0xe0   :  { %v217_v43 = vmul.f32 0.044715, %v1774_v38  ;;  %v1780_v44 = vadd.f32 %v1323_v41, %v75_v29  ;;  %v179_v45 = vpop.f32.mrb[3].mxu0  ;;  %v209_v39 = vmul.f32 0.5, %v1774_v38 }
  0xe1   :  { %v215_v46 = vmul.f32 0.044715, %v1777_v40  ;;  %v1783_v47 = vadd.f32 %v179_v45, %v65_v34 }
  0xe2   :  { %v225_v48 = vmul.f32 %v217_v43, %v1774_v38  ;;  %v218_v49 = vmul.f32 0.044715, %v1780_v44 }
  0xe3   :  { %v223_v50 = vmul.f32 %v215_v46, %v1777_v40  ;;  %v216_v51 = vmul.f32 0.044715, %v1783_v47  ;;  %v520_v46 = vpop.permute.xlu0 %519 }
  0xe4   :  { %v233_v53 = vmul.f32 %v225_v48, %v1774_v38  ;;  %v226_v54 = vmul.f32 %v218_v49, %v1780_v44  ;;  %v207_v48 = vmul.f32 0.5, %v1777_v40 }
  0xe5   :  { %v224_v55 = vmul.f32 %v216_v51, %v1783_v47  ;;  %v1326_v56 = vpop.f32.mrb[4].mxu0  ;;  %v231_v58 = vmul.f32 %v223_v50, %v1777_v40 }
  0xe6   :  { %v234_v59 = vmul.f32 %v226_v54, %v1780_v44  ;;  %v1794_v60 = vadd.f32 %v1326_v56, %v90_v52  ;;  %v192_v61 = vpop.f32.mrb[5].mxu0  ;;  %v241_v62 = vadd.f32 %v233_v53, %v1774_v38  ;;  %v210_v53 = vmul.f32 0.5, %v1780_v44 }
  0xe7   :  { %v1797_v63 = vadd.f32 %v192_v61, %v80_v33  ;;  %v1327_v0 = vpop.f32.mrb[6].mxu0  ;;  %v232_v1 = vmul.f32 %v224_v55, %v1783_v47  ;;  %v239_v2 = vadd.f32 %v231_v58, %v1777_v40 }
  0xe8   :  { %v221_v3 = vmul.f32 0.044715, %v1794_v60  ;;  %v1802_v4 = vadd.f32 %v1327_v0, %v95_v57  ;;  %v195_v5 = vpop.f32.mrb[7].mxu0  ;;  %v242_v6 = vadd.f32 %v234_v59, %v1780_v44  ;;  %v249_v7 = vmul.f32 0.7978846, %v241_v62 }
  0xe9   :  { %v219_v8 = vmul.f32 0.044715, %v1797_v63  ;;  %v1806_v9 = vadd.f32 %v195_v5, %v85_v37  ;;  %v240_v10 = vadd.f32 %v232_v1, %v1783_v47  ;;  %v247_v11 = vmul.f32 0.7978846, %v239_v2 }
  0xea   :  { %v229_v12 = vmul.f32 %v221_v3, %v1794_v60  ;;  %v222_v13 = vmul.f32 0.044715, %v1802_v4  ;;  %v250_v14 = vmul.f32 0.7978846, %v242_v6  ;;  %1477 = vtanh.f32 %v249_v7 }
  0xeb   :  { %v227_v15 = vmul.f32 %v219_v8, %v1797_v63  ;;  %v220_v16 = vmul.f32 0.044715, %v1806_v9  ;;  %v248_v17 = vmul.f32 0.7978846, %v240_v10  ;;  %1479 = vtanh.f32 %v247_v11  ;;  %v532_v10 = vpop.permute.xlu0 %531 }
  0xec   :  { %1481 = vtanh.f32 %v250_v14  ;;  %v230_v19 = vmul.f32 %v222_v13, %v1802_v4  ;;  %v237_v22 = vmul.f32 %v229_v12, %v1794_v60  ;;  %v208_v12 = vmul.f32 0.5, %v1783_v47 }
  0xed   :  { %v235_v18 = vmul.f32 %v227_v15, %v1797_v63  ;;  %v228_v20 = vmul.f32 %v220_v16, %v1806_v9  ;;  %v1348_v21 = vpop.f32.mrb[8].mxu0  ;;  %1483 = vtanh.f32 %v248_v17 }
  0xee   :  { %v1818_v23 = vadd.f32 %v1348_v21, %v1766_v31  ;;  %v625_v24 = vpop.f32.mrb[9].mxu0  ;;  %v238_v29 = vmul.f32 %v230_v19, %v1802_v4  ;;  %v245_v41 = vadd.f32 %v237_v22, %v1794_v60 }
  0xef   :  { %v236_v25 = vmul.f32 %v228_v20, %v1806_v9  ;;  %v1822_v26 = vadd.f32 %v625_v24, %v1764_v30  ;;  %v243_v27 = vadd.f32 %v235_v18, %v1797_v63 }
  0xf0   :  { %v1826_v28 = vmul.f32 100.0, %v1818_v23  ;;  %v246_v56 = vadd.f32 %v238_v29, %v1802_v4  ;;  %v253_v61 = vmul.f32 0.7978846, %v245_v41 }
  0xf1   :  { %v1830_v32 = vmul.f32 100.0, %v1822_v26  ;;  %v1351_v33 = vpop.f32.mrb[10].mxu0  ;;  %v244_v31 = vadd.f32 %v236_v25, %v1806_v9  ;;  %v251_v34 = vmul.f32 0.7978846, %v243_v27 }
  0xf2   :  { %v673_v36 = vmin.f32 %v1826_v28, 20.0  ;;  %v1834_v37 = vadd.f32 %v1351_v33, %v516_v42  ;;  %v635_v30 = vpop.f32.mrb[11].mxu0  ;;  %v524_v42 = vpop.permute.xlu1 %523  ;;  %v254_v18 = vmul.f32 0.7978846, %v246_v56  ;;  %vm681_vm5 = vcmp.gt.f32.partialorder %v1826_v28, 20.0 }
  0xf3   :  { %v672_v43 = vmin.f32 %v1830_v32, 20.0  ;;  %v1840_v45 = vadd.f32 %v635_v30, %v1772_v35  ;;  %v252_v49 = vmul.f32 0.7978846, %v244_v31  ;;  %1485 = vtanh.f32 %v251_v34 }
  0xf4   :  { %v1478_v50 = vpop.eup %1477  ;;  %v690_v51 = vmul.f32 1.442695, %v673_v36  ;;  %v1844_v52 = vmul.f32 100.0, %v1834_v37  ;;  %v211_v30 = vmul.f32 0.5, %v1797_v63  ;;  %vm680_vm3 = vcmp.gt.f32.partialorder %v1830_v32, 20.0 }
  0xf5   :  { %v1480_v38 = vpop.eup %1479  ;;  %v688_v54 = vmul.f32 1.442695, %v672_v43  ;;  %v1848_v55 = vmul.f32 100.0, %v1840_v45  ;;  %v1354_v35 = vpop.f32.mrb[12].mxu0  ;;  %1487 = vtanh.f32 %v252_v49  ;;  %v265_v1 = vadd.f32 1.0, %v1478_v50 }
  0xf6   :  { %v1482_v40 = vpop.eup %1481  ;;  %1489 = vpow2.f32 %v690_v51  ;;  %v675_v57 = vmin.f32 %v1844_v52, 20.0  ;;  %v1852_v58 = vadd.f32 %v1354_v35, %v524_v42  ;;  %v645_v59 = vpop.f32.mrb[13].mxu0  ;;  %v263_v5 = vadd.f32 1.0, %v1480_v38 }
  0xf7   :  { %v1484_v62 = vpop.eup %1483  ;;  %1491 = vpow2.f32 %v688_v54  ;;  %v674_v44 = vmin.f32 %v1848_v55, 20.0  ;;  %v1855_v0 = vadd.f32 %v645_v59, %v520_v46  ;;  %v266_v13 = vadd.f32 1.0, %v1482_v40  ;;  %v528_v15 = vpop.permute.xlu1 %527 }
  0xf8   :  { %v694_v2 = vmul.f32 1.442695, %v675_v57  ;;  %v1858_v3 = vmul.f32 100.0, %v1852_v58  ;;  %v264_v6 = vadd.f32 1.0, %v1484_v62  ;;  %v273_v21 = vmul.f32 %v265_v1, %v209_v39 }
  0xf9   :  { %v692_v7 = vmul.f32 1.442695, %v674_v44  ;;  %v1861_v8 = vmul.f32 100.0, %v1855_v0  ;;  %v1357_v11 = vpop.f32.mrb[14].mxu0  ;;  %v271_v47 = vmul.f32 %v263_v5, %v207_v48  ;;  %v274_v33 = vmul.f32 %v266_v13, %v210_v53 }
  0xfa   :  { %1493 = vpow2.f32 %v694_v2  ;;  %v677_v14 = vmin.f32 %v1858_v3, 20.0  ;;  %v1865_v16 = vadd.f32 %v1357_v11, %v532_v10  ;;  %v655_v17 = vpop.f32.mrb[15].mxu0  ;;  %v272_v25 = vmul.f32 %v264_v6, %v208_v12 }
  0xfb   :  { %1495 = vpow2.f32 %v692_v7  ;;  %v676_v19 = vmin.f32 %v1861_v8, 20.0  ;;  %v1868_v20 = vadd.f32 %v655_v17, %v528_v15  ;;  %v288_v43 = vpack.c.bf16 %v274_v33, %v273_v21 }
  0xfc   :  { %v698_v22 = vmul.f32 1.442695, %v677_v14  ;;  %v1871_v24 = vmul.f32 100.0, %v1865_v16  ;;  %1497 = vtanh.f32 %v253_v61  ;;  %v287_v36 = vpack.c.bf16 %v272_v25, %v271_v47 }
  0xfd   :  { %v696_v27 = vmul.f32 1.442695, %v676_v19  ;;  %v1874_v29 = vmul.f32 100.0, %v1868_v20  ;;  %v1486_v31 = vpop.eup %1485  ;;  %v212_v46 = vmul.f32 0.5, %v1806_v9  ;;  %v213_v5 = vmul.f32 0.5, %v1794_v60 }
  0xfe   :  { %1499 = vpow2.f32 %v698_v22  ;;  %v679_v34 = vmin.f32 %v1871_v24, 20.0  ;;  %1328 = vmatprep.subr.bf16.mxu1 %v287_v36  ;;  %v267_v50 = vadd.f32 1.0, %v1486_v31  ;;  %v214_v11 = vmul.f32 0.5, %v1802_v4 }
  0xff   :  { %v1488_v39 = vpop.eup %1487  ;;  %1501 = vpow2.f32 %v696_v27  ;;  %v678_v41 = vmin.f32 %v1874_v29, 20.0  ;;  %1329 = vmatpush3.bf16.msra.mxu1 %v287_v36  ;;  %vm682_vm7 = vcmp.gt.f32.partialorder %v1848_v55, 20.0  ;;  %vm683_vm9 = vcmp.gt.f32.partialorder %v1844_v52, 20.0 }
 0x100   :  { %v1490_v48 = vpop.eup %1489  ;;  %v702_v49 = vmul.f32 1.442695, %v679_v34  ;;  %v268_v51 = vadd.f32 1.0, %v1488_v39  ;;  %1503 = vtanh.f32 %v254_v18  ;;  %1330 = vmatprep.subr.bf16.mxu1 %v288_v43  ;;  %v275_v63 = vmul.f32 %v267_v50, %v211_v30 }
 0x101   :  { %v1492_v42 = vpop.eup %1491  ;;  %v700_v53 = vmul.f32 1.442695, %v678_v41  ;;  %v713_v38 = vadd.f32 1.0, %v1490_v48  ;;  %v716_v9 = vmul.f32 -0.5, %v1490_v48  ;;  %v719_v1 = vand.u32 2147483647, %v1490_v48 }
 0x102   :  { %1505 = vpow2.f32 %v702_v49  ;;  %v276_v54 = vmul.f32 %v268_v51, %v212_v46  ;;  %v704_v35 = vadd.f32 1.0, %v1492_v42  ;;  %v707_v59 = vmul.f32 -0.5, %v1492_v42 }
 0x103   :  { %1507 = vpow2.f32 %v700_v53  ;;  %1331 = vmatpush3.bf16.msra.mxu1 %v288_v43  ;;  %v710_v6 = vand.u32 2147483647, %v1492_v42  ;;  %v717_v7 = vadd.f32 1.0, %v716_v9  ;;  %vm1897_vm4 = vcmp.lt.f32.partialorder %v719_v1, 0.0004427343 }
 0x104   :  { %v1880_v56 = vpop.eup %1493  ;;  %v289_v40 = vpack.c.bf16 %v276_v54, %v275_v63  ;;  %1509 = vlog2.f32 %v704_v35  ;;  %v708_v15 = vadd.f32 1.0, %v707_v59  ;;  %v1470_v35 = vld [vmem:[%s2246_s3 + $0x8] sm:$0xff]   ;;  %vm685_vm13 = vcmp.gt.f32.partialorder %v1858_v3, 20.0 }
 0x105   :  { %v1882_v57 = vpop.eup %1495  ;;  %1511 = vlog2.f32 %v713_v38  ;;  %v731_v62 = vadd.f32 1.0, %v1880_v56  ;;  %v734_v18 = vmul.f32 -0.5, %v1880_v56  ;;  %vm1905_vm6 = vcmp.lt.f32.partialorder %v710_v6, 0.0004427343 }
 0x106   :  { %1332 = vmatprep.subr.bf16.mxu1 %v289_v40  ;;  %v722_v61 = vadd.f32 1.0, %v1882_v57  ;;  %v1498_v44 = vpop.eup %1497  ;;  %v725_v17 = vmul.f32 -0.5, %v1882_v57  ;;  %v728_v4 = vand.u32 2147483647, %v1882_v57  ;;  %v718_v25 = vmul.f32 %v1490_v48, %v717_v7 }
 0x107   :  { %1333 = vmatpush3.bf16.msra.mxu1 %v289_v40  ;;  %v269_v12 = vadd.f32 1.0, %v1498_v44  ;;  %v737_v27 = vand.u32 2147483647, %v1880_v56  ;;  %v709_v41 = vmul.f32 %v1492_v42, %v708_v15  ;;  %v735_v46 = vadd.f32 1.0, %v734_v18 }
 0x108   :  { %v1886_v2 = vpop.eup %1499  ;;  %1513 = vlog2.f32 %v722_v61  ;;  %v726_v43 = vadd.f32 1.0, %v725_v17  ;;  %vm1916_vm8 = vcmp.lt.f32.partialorder %v728_v4, 0.0004427343  ;;  %vm684_vm14 = vcmp.gt.f32.partialorder %v1861_v8, 20.0 }
 0x109   :  { %v1889_v10 = vpop.eup %1501  ;;  %1515 = vlog2.f32 %v731_v62  ;;  %v749_v13 = vadd.f32 1.0, %v1886_v2  ;;  %v277_v31 = vmul.f32 %v269_v12, %v213_v5  ;;  %v752_v36 = vmul.f32 -0.5, %v1886_v2  ;;  %v1471_v62 = vld [vmem:[%s2246_s3 + $0x10] sm:$0xff]  }
 0x10a   :  { %v1504_v14 = vpop.eup %1503  ;;  %v740_v60 = vadd.f32 1.0, %v1889_v10  ;;  %v743_v38 = vmul.f32 -0.5, %v1889_v10  ;;  %vm1922_vm10 = vcmp.lt.f32.partialorder %v737_v27, 0.0004427343  ;;  %v746_v54 = vand.u32 2147483647, %v1889_v10 }
 0x10b   :  { %v270_v19 = vadd.f32 1.0, %v1504_v14  ;;  %1517 = vlog2.f32 %v749_v13  ;;  %v753_v9 = vadd.f32 1.0, %v752_v36  ;;  %v755_v59 = vand.u32 2147483647, %v1886_v2 }
 0x10c   :  { %v1902_v22 = vpop.eup %1505  ;;  %1519 = vlog2.f32 %v740_v60  ;;  %v727_v5 = vmul.f32 %v1882_v57, %v726_v43  ;;  %v736_v6 = vmul.f32 %v1880_v56, %v735_v46  ;;  %v744_v13 = vadd.f32 1.0, %v743_v38 }
 0x10d   :  { %v1910_v33 = vpop.eup %1507  ;;  %v278_v34 = vmul.f32 %v270_v19, %v214_v11  ;;  %v767_v30 = vadd.f32 1.0, %v1902_v22  ;;  %vm1944_vm11 = vcmp.lt.f32.partialorder %v746_v54, 0.0004427343  ;;  %v770_v60 = vmul.f32 -0.5, %v1902_v22 }
 0x10e   :  { %v1510_v39 = vpop.eup %1509  ;;  %v758_v49 = vadd.f32 1.0, %v1910_v33  ;;  %v761_v14 = vmul.f32 -0.5, %v1910_v33  ;;  %v754_v32 = vmul.f32 %v1886_v2, %v753_v9  ;;  %vm1956_vm12 = vcmp.lt.f32.partialorder %v755_v59, 0.0004427343  ;;  %v2008_v9 = vpop.permute.xlu1 %805  ;;  %v1209_v59 = vld [vmem:[%s2252_s9] sm:$0xff] }
 0x10f   :  { %v1512_v50 = vpop.eup %1511  ;;  %v290_v48 = vpack.c.bf16 %v278_v34, %v277_v31  ;;  %v706_v51 = vmul.f32 0.6931472, %v1510_v39  ;;  %v745_v31 = vmul.f32 %v1889_v10, %v744_v13  ;;  %v771_v39 = vadd.f32 1.0, %v770_v60  ;;  %1212 = vperm.xlu1 %1461, %v1209_v59  }
 0x110   :  { %v715_v63 = vmul.f32 0.6931472, %v1512_v50  ;;  %1521 = vlog2.f32 %v758_v49  ;;  %v762_v34 = vadd.f32 1.0, %v761_v14  ;;  %vm686_vm1 = vcmp.gt.f32.partialorder %v1874_v29, 20.0  ;;  %v1475_v29 = vld [vmem:[%s2248_s5 + $0x10] sm:$0xff]  }
 0x111   :  { %1334 = vmatprep.subr.bf16.mxu1 %v290_v48  ;;  %v712_v40 = vsel %vm1905_vm6, %v709_v41, %v706_v51  ;;  %1523 = vlog2.f32 %v767_v30  ;;  %v764_v30 = vand.u32 2147483647, %v1910_v33  ;;  %v1472_v41 = vld [vmem:[%s2246_s3 + $0x18] sm:$0xff]   ;;  %v772_v3 = vmul.f32 %v1902_v22, %v771_v39 }
 0x112   :  { %v1514_v61 = vpop.eup %1513  ;;  %1335 = vmatpush3.bf16.msra.mxu1 %v290_v48  ;;  %v721_v44 = vsel %vm1897_vm4, %v718_v25, %v715_v63  ;;  %v776_v1 = vmul.f32 0.01, %v712_v40  ;;  %v1473_v48 = vld [vmem:[%s2248_s5] sm:$0xff]   ;;  %v763_v53 = vmul.f32 %v1910_v33, %v762_v34  ;;  %v1474_v40 = vld [vmem:[%s2248_s5 + $0x8] sm:$0xff]   ;;  %vm1602_vm4 = vmmov 0  }
 0x113   :  { %v1516_v7 = vpop.eup %1515  ;;  %v777_v11 = vmul.f32 0.01, %v721_v44  ;;  %v724_v12 = vmul.f32 0.6931472, %v1514_v61  ;;  %vm765_vm15 = vcmp.lt.f32.partialorder %v764_v30, 0.0004427343  ;;  %v2013_v61 = vpop.permute.xlu1 %813 }
 0x114   :  { %v784_v15 = vsel %vm680_vm3, %v1822_v26, %v776_v1  ;;  %v733_v17 = vmul.f32 0.6931472, %v1516_v7  ;;  %vm687_vm3 = vcmp.gt.f32.partialorder %v1871_v24, 20.0  ;;  %v1603_v24 = vmov 0.0  }
 0x115   :  { %v1518_v57 = vpop.eup %1517  ;;  %1337 = vmatmul.mubr.msk.bf16.vlgmr.msra.gmra.mrb[0].mxu1 %vm343_vm2, %v1470_v35  ;;  %v785_v56 = vsel %vm681_vm5, %v1818_v23, %v777_v11  ;;  %v730_v19 = vsel %vm1916_vm8, %v727_v5, %v724_v12  ;;  %1390 = vmatprep.mubr.msk.f32.mxu0 %vm1602_vm4, %v1603_v24  ;;  %v2019_v5 = vpop.permute.xlu0 %809 }
 0x116   :  { %v1520_v21 = vpop.eup %1519  ;;  %1340 = vmatprep.mubr.msk.bf16.mxu1 %vm343_vm2, %v1471_v62  ;;  %v800_v4 = vpack.c.bf16 %v785_v56, %v784_v15  ;;  %v739_v47 = vsel %vm1922_vm10, %v736_v6, %v733_v17  ;;  %v778_v25 = vmul.f32 0.01, %v730_v19  ;;  %v751_v27 = vmul.f32 0.6931472, %v1518_v57 }
 0x117   :  { %v779_v28 = vmul.f32 0.01, %v739_v47  ;;  %v742_v23 = vmul.f32 0.6931472, %v1520_v21  ;;  %v2015_v62 = vpop.permute.xlu1 %817 }
 0x118   :  { %1358 = vmatprep.subr.bf16.mxu1 %v800_v4  ;;  %v786_v2 = vsel %vm682_vm7, %v1840_v45, %v778_v25  ;;  %v757_v36 = vsel %vm1956_vm12, %v754_v32, %v751_v27  ;;  %v773_v45 = vand.u32 2147483647, %v1902_v22 }
 0x119   :  { %1359 = vmatpush3.bf16.msra.mxu1 %v800_v4  ;;  %v787_v10 = vsel %vm683_vm9, %v1834_v37, %v779_v28  ;;  %v748_v43 = vsel %vm1944_vm11, %v745_v31, %v742_v23  ;;  %v781_v55 = vmul.f32 0.01, %v757_v36  ;;  %v293_v7 = vpop.permute.xlu0 %292 }
 0x11a   :  { %v1522_v46 = vpop.eup %1521  ;;  %v801_v49 = vpack.c.bf16 %v787_v10, %v786_v2  ;;  %v780_v50 = vmul.f32 0.01, %v748_v43  ;;  %vm774_vm0 = vcmp.lt.f32.partialorder %v773_v45, 0.0004427343 }
 0x11b   :  { %v1524_v51 = vpop.eup %1523  ;;  %v789_v37 = vsel %vm685_vm13, %v1852_v58, %v781_v55  ;;  %v760_v52 = vmul.f32 0.6931472, %v1522_v46  ;;  %v2017_v44 = vpop.permute.xlu1 %825 }
 0x11c   :  { %1360 = vmatprep.subr.bf16.mxu1 %v801_v49  ;;  %v788_v38 = vsel %vm684_vm14, %v1855_v0, %v780_v50  ;;  %v769_v63 = vmul.f32 0.6931472, %v1524_v51 }
 0x11d   :  { %1341 = vmatmul.mubr.msk.bf16.gmra.mrb[4].mxu1 %vm343_vm2, %v1472_v41  ;;  %v802_v42 = vpack.c.bf16 %v789_v37, %v788_v38  ;;  %v766_v54 = vsel %vm765_vm15, %v763_v53, %v760_v52  ;;  %v2023_v12 = vpop.permute.xlu0 %821 }
 0x11e   :  { %1361 = vmatpush3.bf16.msra.mxu1 %v801_v49  ;;  %v775_v35 = vsel %vm774_vm0, %v772_v3, %v769_v63  ;;  %v782_v8 = vmul.f32 0.01, %v766_v54  ;;  %1366 = vmatprep.mubr.msk.bf16.mxu1 %vm343_vm2, %v1473_v48 }
 0x11f   :  { %1362 = vmatprep.subr.bf16.mxu1 %v802_v42  ;;  %v783_v58 = vmul.f32 0.01, %v775_v35  ;;  %v297_v1 = vpop.permute.xlu1 %296 }
 0x120   :  { %v790_v0 = vsel %vm686_vm1, %v1868_v20, %v782_v8  ;;  %v1601_v20 = vmov 0.0|0.0  }
 0x121   :  { %v791_v22 = vsel %vm687_vm3, %v1865_v16, %v783_v58  ;;  %v1476_v16 = vld [vmem:[%s2248_s5 + $0x18] sm:$0xff]   ;;  %1412 = vmatprep.subr.bf16.mxu0 %v1601_v20  ;;  %v2025_v14 = vpop.permute.xlu0 %833 }
 0x122   :  { %1363 = vmatpush3.bf16.msra.mxu1 %v802_v42  ;;  %v803_v33 = vpack.c.bf16 %v791_v22, %v790_v0 }
 0x123   :  { %v2021_v6 = vpop.permute.xlu1 %829 }
 0x124   :  { %1364 = vmatprep.subr.bf16.mxu1 %v803_v33 }
 0x125   :  { %v309_v19 = vpop.permute.xlu0 %308 }
 0x126   :  { %1365 = vmatpush3.bf16.msra.mxu1 %v803_v33 }
 0x127   :  { %1424 = vmatprep.subr.bf16.mxu1 %v1601_v20  ;;  %v301_v11 = vpop.permute.xlu1 %300 }
 0x129   :  { %1367 = vmatmul.mubr.msk.bf16.vlgmr.msra.gmra.mrb[8].mxu1 %vm343_vm2, %v1474_v40  ;;  %v321_v41 = vpop.permute.xlu0 %320 }
 0x12a   :  { %1370 = vmatprep.mubr.msk.bf16.mxu1 %vm343_vm2, %v1475_v29 }
 0x12b   :  { %v305_v13 = vpop.permute.xlu1 %304 }
 0x12f   :  { %v313_v17 = vpop.permute.xlu1 %312 }
 0x131   :  { %1371 = vmatmul.mubr.msk.bf16.gmra.mrb[12].mxu1 %vm343_vm2, %v1476_v16 }
 0x132   :  { %1409 = vmatprep.mubr.msk.f32.mxu1 %vm1602_vm4, %v1603_v24 }
 0x133   :  { %v317_v31 = vpop.permute.xlu1 %316 }
 0x1e8   :  { %v1338_v15 = vpop.f32.mrb[0].mxu1 }
 0x1e9   :  { %v2027_v18 = vadd.f32 %v1338_v15, %v301_v11  ;;  %v390_v60 = vpop.f32.mrb[1].mxu1 }
 0x1ea   :  { %v2029_v57 = vadd.f32 %v390_v60, %v293_v7  ;;  %v1339_v56 = vpop.f32.mrb[2].mxu1 }
 0x1eb   :  { %v431_v32 = vmul.f32 0.044715, %v2027_v18  ;;  %v2032_v26 = vadd.f32 %v1339_v56, %v305_v13  ;;  %v393_v21 = vpop.f32.mrb[3].mxu1 }
 0x1ec   :  { %v429_v4 = vmul.f32 0.044715, %v2029_v57  ;;  %v2035_v47 = vadd.f32 %v393_v21, %v297_v1 }
 0x1ed   :  { %v439_v25 = vmul.f32 %v431_v32, %v2027_v18  ;;  %v432_v27 = vmul.f32 0.044715, %v2032_v26 }
 0x1ee   :  { %v437_v28 = vmul.f32 %v429_v4, %v2029_v57  ;;  %v430_v23 = vmul.f32 0.044715, %v2035_v47 }
 0x1ef   :  { %v447_v34 = vmul.f32 %v439_v25, %v2027_v18  ;;  %v440_v2 = vmul.f32 %v432_v27, %v2032_v26  ;;  %v423_v27 = vmul.f32 0.5, %v2027_v18 }
 0x1f0   :  { %v445_v36 = vmul.f32 %v437_v28, %v2029_v57  ;;  %v438_v30 = vmul.f32 %v430_v23, %v2035_v47  ;;  %v1342_v39 = vpop.f32.mrb[4].mxu1 }
 0x1f1   :  { %v455_v10 = vadd.f32 %v447_v34, %v2027_v18  ;;  %v448_v43 = vmul.f32 %v440_v2, %v2032_v26  ;;  %v2047_v55 = vadd.f32 %v1342_v39, %v317_v31  ;;  %v406_v45 = vpop.f32.mrb[5].mxu1  ;;  %v424_v18 = vmul.f32 0.5, %v2032_v26 }
 0x1f2   :  { %v453_v46 = vadd.f32 %v445_v36, %v2029_v57  ;;  %v446_v49 = vmul.f32 %v438_v30, %v2035_v47  ;;  %v2051_v50 = vadd.f32 %v406_v45, %v309_v19  ;;  %v1343_v48 = vpop.f32.mrb[6].mxu1 }
 0x1f3   :  { %v463_v51 = vmul.f32 0.7978846, %v455_v10  ;;  %v456_v37 = vadd.f32 %v448_v43, %v2032_v26  ;;  %v435_v52 = vmul.f32 0.044715, %v2047_v55  ;;  %v2055_v53 = vadd.f32 %v1343_v48, %v321_v41  ;;  %v409_v38 = vpop.f32.mrb[7].mxu1 }
 0x1f4   :  { %v461_v63 = vmul.f32 0.7978846, %v453_v46  ;;  %v454_v3 = vadd.f32 %v446_v49, %v2035_v47  ;;  %v433_v42 = vmul.f32 0.044715, %v2051_v50  ;;  %v2059_v54 = vadd.f32 %v409_v38, %v313_v17 }
 0x1f5   :  { %1525 = vtanh.f32 %v463_v51  ;;  %v464_v35 = vmul.f32 0.7978846, %v456_v37  ;;  %v443_v8 = vmul.f32 %v435_v52, %v2047_v55  ;;  %v436_v58 = vmul.f32 0.044715, %v2055_v53 }
 0x1f6   :  { %1527 = vtanh.f32 %v461_v63  ;;  %v462_v0 = vmul.f32 0.7978846, %v454_v3  ;;  %v441_v22 = vmul.f32 %v433_v42, %v2051_v50  ;;  %v434_v33 = vmul.f32 0.044715, %v2059_v54 }
 0x1f7   :  { %1529 = vtanh.f32 %v464_v35  ;;  %v451_v40 = vmul.f32 %v443_v8, %v2047_v55  ;;  %v444_v29 = vmul.f32 %v436_v58, %v2055_v53  ;;  %v422_v46 = vmul.f32 0.5, %v2035_v47 }
 0x1f8   :  { %1531 = vtanh.f32 %v462_v0  ;;  %v449_v16 = vmul.f32 %v441_v22, %v2051_v50  ;;  %v442_v24 = vmul.f32 %v434_v33, %v2059_v54 }
 0x1f9   :  { %v452_v59 = vmul.f32 %v444_v29, %v2055_v53  ;;  %v459_v11 = vadd.f32 %v451_v40, %v2047_v55 }
 0x1fa   :  { %v457_v1 = vadd.f32 %v449_v16, %v2051_v50  ;;  %v450_v7 = vmul.f32 %v442_v24, %v2059_v54 }
 0x1fb   :  { %v460_v13 = vadd.f32 %v452_v59, %v2055_v53  ;;  %v467_v23 = vmul.f32 0.7978846, %v459_v11 }
 0x1fc   :  { %v465_v15 = vmul.f32 0.7978846, %v457_v1  ;;  %v458_v17 = vadd.f32 %v450_v7, %v2059_v54  ;;  %v1368_v60 = vpop.f32.mrb[8].mxu1 }
 0x1fd   :  { %v468_v56 = vmul.f32 0.7978846, %v460_v13  ;;  %v2076_v19 = vadd.f32 %v1368_v60, %v2013_v61  ;;  %v902_v32 = vpop.f32.mrb[9].mxu1  ;;  %v421_v61 = vmul.f32 0.5, %v2029_v57 }
 0x1fe   :  { %1533 = vtanh.f32 %v465_v15  ;;  %v466_v21 = vmul.f32 0.7978846, %v458_v17  ;;  %v2079_v4 = vadd.f32 %v902_v32, %v2008_v9  ;;  %v1369_v25 = vpop.f32.mrb[10].mxu1 }
 0x1ff   :  { %v1526_v28 = vpop.eup %1525  ;;  %v2083_v31 = vmul.f32 100.0, %v2076_v19  ;;  %v2086_v34 = vadd.f32 %v1369_v25, %v2015_v62  ;;  %v905_v2 = vpop.f32.mrb[11].mxu1 }
 0x200   :  { %v1528_v36 = vpop.eup %1527  ;;  %1535 = vtanh.f32 %v466_v21  ;;  %v2090_v30 = vmul.f32 100.0, %v2079_v4  ;;  %v2093_v9 = vadd.f32 %v905_v2, %v2019_v5  ;;  %v479_v5 = vadd.f32 1.0, %v1526_v28 }
 0x201   :  { %v1530_v39 = vpop.eup %1529  ;;  %1537 = vtanh.f32 %v468_v56  ;;  %v943_v41 = vmin.f32 %v2083_v31, 20.0  ;;  %v2098_v62 = vmul.f32 100.0, %v2086_v34  ;;  %v477_v10 = vadd.f32 1.0, %v1528_v36 }
 0x202   :  { %v1532_v43 = vpop.eup %1531  ;;  %v941_v57 = vmin.f32 %v2090_v30, 20.0  ;;  %v2102_v45 = vmul.f32 100.0, %v2093_v9  ;;  %1539 = vtanh.f32 %v467_v23  ;;  %v480_v63 = vadd.f32 1.0, %v1530_v39 }
 0x203   :  { %v961_v49 = vmul.f32 1.442695, %v943_v41  ;;  %v944_v26 = vmin.f32 %v2098_v62, 20.0  ;;  %v478_v48 = vadd.f32 1.0, %v1532_v43  ;;  %v485_v38 = vmul.f32 %v477_v10, %v421_v61 }
 0x204   :  { %v957_v51 = vmul.f32 1.442695, %v941_v57  ;;  %v942_v37 = vmin.f32 %v2102_v45, 20.0  ;;  %v1372_v52 = vpop.f32.mrb[12].mxu1  ;;  %v487_v22 = vmul.f32 %v479_v5, %v423_v27  ;;  %v426_v21 = vmul.f32 0.5, %v2059_v54 }
 0x205   :  { %1541 = vpow2.f32 %v961_v49  ;;  %v963_v3 = vmul.f32 1.442695, %v944_v26  ;;  %v2108_v42 = vadd.f32 %v1372_v52, %v2021_v6  ;;  %v486_v35 = vmul.f32 %v478_v48, %v422_v46  ;;  %v918_v8 = vpop.f32.mrb[13].mxu1 }
 0x206   :  { %1543 = vpow2.f32 %v957_v51  ;;  %v959_v47 = vmul.f32 1.442695, %v942_v37  ;;  %v2111_v58 = vadd.f32 %v918_v8, %v2023_v12  ;;  %v1373_v0 = vpop.f32.mrb[14].mxu1  ;;  %v488_v12 = vmul.f32 %v480_v63, %v424_v18 }
 0x207   :  { %1545 = vpow2.f32 %v963_v3  ;;  %v2114_v33 = vmul.f32 100.0, %v2108_v42  ;;  %v1413_v40 = vpack.c.bf16 %v486_v35, %v485_v38  ;;  %v2117_v29 = vadd.f32 %v1373_v0, %v2025_v14  ;;  %v921_v16 = vpop.f32.mrb[15].mxu1 }
 0x208   :  { %v1534_v6 = vpop.eup %1533  ;;  %1547 = vpow2.f32 %v959_v47  ;;  %v2120_v24 = vmul.f32 100.0, %v2111_v58  ;;  %v2123_v59 = vadd.f32 %v921_v16, %v2017_v44  ;;  %v1416_v17 = vpack.c.bf16 %v488_v12, %v487_v22 }
 0x209   :  { %v947_v1 = vmin.f32 %v2114_v33, 20.0  ;;  %1414 = vmatpush3.bf16.msra.mxu0 %v1413_v40  ;;  %v2127_v7 = vmul.f32 100.0, %v2117_v29  ;;  %v481_v11 = vadd.f32 1.0, %v1534_v6  ;;  %v425_v44 = vmul.f32 0.5, %v2051_v50  ;;  %v1062_v6 = vld [vmem:[%s2250_s7] sm:$0xff] }
 0x20a   :  { %v1536_v13 = vpop.eup %1535  ;;  %v945_v14 = vmin.f32 %v2120_v24, 20.0  ;;  %v2131_v15 = vmul.f32 100.0, %v2123_v59  ;;  %1415 = vmatprep.subr.bf16.mxu0 %v1601_v20  ;;  %v428_v43 = vmul.f32 0.5, %v2055_v53  ;;  %v427_v48 = vmul.f32 0.5, %v2047_v55 }
 0x20b   :  { %v1538_v60 = vpop.eup %1537  ;;  %v969_v56 = vmul.f32 1.442695, %v947_v1  ;;  %v948_v32 = vmin.f32 %v2127_v7, 20.0  ;;  %v482_v25 = vadd.f32 1.0, %v1536_v13  ;;  %v489_v61 = vmul.f32 %v481_v11, %v425_v44 }
 0x20c   :  { %v965_v27 = vmul.f32 1.442695, %v945_v14  ;;  %v946_v28 = vmin.f32 %v2131_v15, 20.0  ;;  %v1540_v23 = vpop.eup %1539  ;;  %v484_v50 = vadd.f32 1.0, %v1538_v60  ;;  %vm951_vm7 = vcmp.gt.f32.partialorder %v2083_v31, 20.0 }
 0x20d   :  { %1549 = vpow2.f32 %v969_v56  ;;  %v971_v2 = vmul.f32 1.442695, %v948_v32  ;;  %1417 = vmatpush3.bf16.msra.mxu0 %v1416_v17  ;;  %v490_v36 = vmul.f32 %v482_v25, %v426_v21  ;;  %v483_v57 = vadd.f32 1.0, %v1540_v23 }
 0x20e   :  { %1551 = vpow2.f32 %v965_v27  ;;  %v967_v18 = vmul.f32 1.442695, %v946_v28  ;;  %1418 = vmatprep.subr.bf16.mxu0 %v1601_v20  ;;  %v492_v51 = vmul.f32 %v484_v50, %v428_v43  ;;  %vm952_vm8 = vcmp.gt.f32.partialorder %v2098_v62, 20.0 }
 0x20f   :  { %v1542_v39 = vpop.eup %1541  ;;  %1553 = vpow2.f32 %v971_v2  ;;  %v1419_v41 = vpack.c.bf16 %v490_v36, %v489_v61  ;;  %v491_v53 = vmul.f32 %v483_v57, %v427_v48  ;;  %vm949_vm9 = vcmp.gt.f32.partialorder %v2090_v30, 20.0 }
 0x210   :  { %v1544_v10 = vpop.eup %1543  ;;  %v991_v54 = vadd.f32 1.0, %v1542_v39  ;;  %1555 = vpow2.f32 %v967_v18  ;;  %v994_v37 = vmul.f32 -0.5, %v1542_v39  ;;  %v997_v3 = vand.u32 2147483647, %v1542_v39 }
 0x211   :  { %v1546_v46 = vpop.eup %1545  ;;  %v973_v5 = vadd.f32 1.0, %v1544_v10  ;;  %1420 = vmatpush3.bf16.msra.mxu0 %v1419_v41  ;;  %v976_v52 = vmul.f32 -0.5, %v1544_v10  ;;  %v979_v35 = vand.u32 2147483647, %v1544_v10  ;;  %v1422_v8 = vpack.c.bf16 %v492_v51, %v491_v53 }
 0x212   :  { %v2140_v49 = vpop.eup %1547  ;;  %1557 = vlog2.f32 %v991_v54  ;;  %v1000_v26 = vadd.f32 1.0, %v1546_v46  ;;  %1421 = vmatprep.subr.bf16.mxu0 %v1601_v20  ;;  %v1003_v63 = vmul.f32 -0.5, %v1546_v46  ;;  %v995_v0 = vadd.f32 1.0, %v994_v37 }
 0x213   :  { %1559 = vlog2.f32 %v973_v5  ;;  %v982_v38 = vadd.f32 1.0, %v2140_v49  ;;  %v977_v22 = vadd.f32 1.0, %v976_v52  ;;  %v985_v55 = vmul.f32 -0.5, %v2140_v49 }
 0x214   :  { %1561 = vlog2.f32 %v1000_v26  ;;  %v1004_v1 = vadd.f32 1.0, %v1003_v63  ;;  %v1006_v11 = vand.u32 2147483647, %v1546_v46  ;;  %vm2156_vm5 = vcmp.lt.f32.partialorder %v997_v3, 0.0004427343 }
 0x215   :  { %1563 = vlog2.f32 %v982_v38  ;;  %1423 = vmatpush3.bf16.msra.mxu0 %v1422_v8  ;;  %vm2160_vm6 = vcmp.lt.f32.partialorder %v979_v35, 0.0004427343  ;;  %v996_v56 = vmul.f32 %v1542_v39, %v995_v0  ;;  %v978_v32 = vmul.f32 %v1544_v10, %v977_v22 }
 0x216   :  { %v986_v27 = vadd.f32 1.0, %v985_v55  ;;  %v988_v28 = vand.u32 2147483647, %v2140_v49  ;;  %v1005_v36 = vmul.f32 %v1546_v46, %v1004_v1  ;;  %vm2171_vm10 = vcmp.lt.f32.partialorder %v1006_v11, 0.0004427343 }
 0x217   :  { %v1550_v47 = vpop.eup %1549  ;;  %vm950_vm11 = vcmp.gt.f32.partialorder %v2102_v45, 20.0  ;;  %vm955_vm1 = vcmp.gt.f32.partialorder %v2114_v33, 20.0  ;;  %vm956_vm3 = vcmp.gt.f32.partialorder %v2127_v7, 20.0  ;;  %vm953_vm4 = vcmp.gt.f32.partialorder %v2120_v24, 20.0 }
 0x218   :  { %v2145_v40 = vpop.eup %1551  ;;  %v1027_v16 = vadd.f32 1.0, %v1550_v47  ;;  %v1030_v21 = vmul.f32 -0.5, %v1550_v47  ;;  %1391 = vmatmul.mubr.msk.f32.vlgmr.msra.gmra.mrb[16].mxu0 %vm343_vm2, %v1062_v6  ;;  %v1033_v10 = vand.u32 2147483647, %v1550_v47  ;;  %v987_v37 = vmul.f32 %v2140_v49, %v986_v27 }
 0x219   :  { %v2151_v12 = vpop.eup %1553  ;;  %v1009_v13 = vadd.f32 1.0, %v2145_v40  ;;  %v1012_v50 = vmul.f32 -0.5, %v2145_v40  ;;  %v1015_v54 = vand.u32 2147483647, %v2145_v40  ;;  %vm989_vm12 = vcmp.lt.f32.partialorder %v988_v28, 0.0004427343 }
 0x21a   :  { %v2154_v14 = vpop.eup %1555  ;;  %1565 = vlog2.f32 %v1027_v16  ;;  %v1036_v60 = vadd.f32 1.0, %v2151_v12  ;;  %v1031_v5 = vadd.f32 1.0, %v1030_v21  ;;  %v1039_v46 = vmul.f32 -0.5, %v2151_v12 }
 0x21b   :  { %1567 = vlog2.f32 %v1009_v13  ;;  %v1018_v23 = vadd.f32 1.0, %v2154_v14  ;;  %v1013_v53 = vadd.f32 1.0, %v1012_v50  ;;  %v1021_v63 = vmul.f32 -0.5, %v2154_v14 }
 0x21c   :  { %v1558_v25 = vpop.eup %1557  ;;  %1569 = vlog2.f32 %v1036_v60  ;;  %vm2187_vm13 = vcmp.lt.f32.partialorder %v1033_v10, 0.0004427343  ;;  %v1032_v22 = vmul.f32 %v1550_v47, %v1031_v5  ;;  %vm2191_vm14 = vcmp.lt.f32.partialorder %v1015_v54, 0.0004427343 }
 0x21d   :  { %v1560_v2 = vpop.eup %1559  ;;  %v993_v61 = vmul.f32 0.6931472, %v1558_v25  ;;  %1571 = vlog2.f32 %v1018_v23  ;;  %v1040_v49 = vadd.f32 1.0, %v1039_v46  ;;  %v1042_v13 = vand.u32 2147483647, %v2151_v12 }
 0x21e   :  { %v1562_v39 = vpop.eup %1561  ;;  %v975_v41 = vmul.f32 0.6931472, %v1560_v2  ;;  %v1014_v60 = vmul.f32 %v2145_v40, %v1013_v53 }
 0x21f   :  { %v999_v43 = vsel %vm2156_vm5, %v996_v56, %v993_v61  ;;  %v1002_v57 = vmul.f32 0.6931472, %v1562_v39  ;;  %v1564_v26 = vpop.eup %1563  ;;  %v1022_v56 = vadd.f32 1.0, %v1021_v63  ;;  %v1041_v40 = vmul.f32 %v2151_v12, %v1040_v49 }
 0x220   :  { %v1047_v48 = vmul.f32 0.01, %v999_v43  ;;  %v981_v51 = vsel %vm2160_vm6, %v978_v32, %v975_v41  ;;  %v984_v38 = vmul.f32 0.6931472, %v1564_v26  ;;  %vm1043_vm15 = vcmp.lt.f32.partialorder %v1042_v13, 0.0004427343 }
 0x221   :  { %v1008_v52 = vsel %vm2171_vm10, %v1005_v36, %v1002_v57  ;;  %v1045_v3 = vmul.f32 0.01, %v981_v51  ;;  %vm954_vm5 = vcmp.gt.f32.partialorder %v2131_v15, 20.0  ;;  %v1213_v15 = vpop.permute.xlu1 %1212 }
 0x222   :  { %v1048_v35 = vmul.f32 0.01, %v1008_v52  ;;  %v990_v0 = vsel %vm989_vm12, %v987_v37, %v984_v38  ;;  %v1055_v6 = vsel %vm951_vm7, %v2076_v19, %v1047_v48 }
 0x223   :  { %v1046_v11 = vmul.f32 0.01, %v990_v0  ;;  %v1053_v21 = vsel %vm949_vm9, %v2079_v4, %v1045_v3 }
 0x224   :  { %v1566_v16 = vpop.eup %1565  ;;  %v1056_v1 = vsel %vm952_vm8, %v2086_v34, %v1048_v35  ;;  %v1024_v34 = vand.u32 2147483647, %v2154_v14 }
 0x225   :  { %v1568_v17 = vpop.eup %1567  ;;  %v1428_v44 = vpack.c.bf16 %v1056_v1, %v1055_v6  ;;  %v1029_v47 = vmul.f32 0.6931472, %v1566_v16  ;;  %v1054_v19 = vsel %vm950_vm11, %v2093_v9, %v1046_v11  ;;  %v1023_v9 = vmul.f32 %v2154_v14, %v1022_v56 }
 0x226   :  { %v1570_v32 = vpop.eup %1569  ;;  %v1011_v31 = vmul.f32 0.6931472, %v1568_v17  ;;  %v1425_v62 = vpack.c.bf16 %v1054_v19, %v1053_v21  ;;  %vm1025_vm0 = vcmp.lt.f32.partialorder %v1024_v34, 0.0004427343 }
 0x227   :  { %v1035_v25 = vsel %vm2187_vm13, %v1032_v22, %v1029_v47  ;;  %v1038_v27 = vmul.f32 0.6931472, %v1570_v32  ;;  %v1572_v28 = vpop.eup %1571 }
 0x228   :  { %v1051_v23 = vmul.f32 0.01, %v1035_v25  ;;  %v1017_v30 = vsel %vm2191_vm14, %v1014_v60, %v1011_v31  ;;  %v1020_v2 = vmul.f32 0.6931472, %v1572_v28  ;;  %1426 = vmatpush3.bf16.msra.mxu1 %v1425_v62 }
 0x229   :  { %v1044_v4 = vsel %vm1043_vm15, %v1041_v40, %v1038_v27  ;;  %v1049_v45 = vmul.f32 0.01, %v1017_v30  ;;  %1427 = vmatprep.subr.bf16.mxu1 %v1601_v20 }
 0x22a   :  { %v1052_v61 = vmul.f32 0.01, %v1044_v4  ;;  %v1026_v12 = vsel %vm1025_vm0, %v1023_v9, %v1020_v2  ;;  %v1059_v36 = vsel %vm955_vm1, %v2108_v42, %v1051_v23  ;;  %v1061_v42 = vld [vmem:[%s2249_s6] sm:$0xff] }
 0x22b   :  { %v1050_v50 = vmul.f32 0.01, %v1026_v12  ;;  %v1057_v14 = vsel %vm953_vm4, %v2111_v58, %v1049_v45 }
 0x22c   :  { %v1060_v18 = vsel %vm956_vm3, %v2117_v29, %v1052_v61  ;;  %1429 = vmatpush3.bf16.msra.mxu1 %v1428_v44 }
 0x22d   :  { %v1434_v39 = vpack.c.bf16 %v1060_v18, %v1059_v36  ;;  %v1058_v41 = vsel %vm954_vm5, %v2123_v59, %v1050_v50  ;;  %1430 = vmatprep.subr.bf16.mxu1 %v1601_v20 }
 0x22e   :  { %v1431_v33 = vpack.c.bf16 %v1058_v41, %v1057_v14 }
 0x230   :  { %1432 = vmatpush3.bf16.msra.mxu1 %v1431_v33 }
 0x231   :  { %1433 = vmatprep.subr.bf16.mxu1 %v1601_v20 }
 0x234   :  { %1435 = vmatpush3.bf16.msra.mxu1 %v1434_v39 }
 0x237   :  { %1410 = vmatmul.mubr.msk.f32.vlgmr.msra.gmra.mrb[16].mxu1 %vm343_vm2, %v1061_v42 }
 0x2eb   :  { %v1132_v29 = vpop.f32.mrb[16].mxu0 }
 0x2ec   :  { %v1392_v24 = vpop.f32.mrb[17].mxu0 }
 0x30a   :  { %v1205_v7 = vpop.f32.mrb[16].mxu1 }
 0x30b   :  { %v1206_v58 = vadd.f32 %v1205_v7, %v1132_v29  ;;  %v1411_v59 = vpop.f32.mrb[17].mxu1 }
 0x30d   :  { %v1215_v10 = vadd.f32 %v1213_v15, %v1206_v58 }
 0x30f   :  { %1216 = vst [vmem:[#allocation2] sm:$0xff] %v1215_v10 }
 0x310   :  { %1584 = shalt.err (!%p1581_p4)
}
 0x311   :  { %s1585_s11 = scalar_lea.hbm %s2253_s10, 128 }
 0x312   :  { %p1586_p5 = scmp.ne.s32.totalorder %s2253_s10, %s1585_s11  ;;  %p1589_p6 = scmp.lt.u32.totalorder %s1585_s11, %s2253_s10 }
 0x314   :  { %p1591_p7 = pnand %p1589_p6, %p1586_p5 }
 0x316   :  { %1594 = shalt.err (!%p1591_p7)
}
 0x317   :  { %1226 = dma.vmem_to_hbm [thread:$0]  %s1224_s28, 128, %s2253_s10, [#allocation3]  }
 0x318   :  { %1595 = dma.done.wait [#allocation3], 128  }
 0x319   :  { %1596 = vsyncadd [#allocation3], 4294967168 }
 0x31a   :  { %1230 = vsyncpa [#allocation3], 1 }

</bundles_post_ra>
